<compile_context>
chip_gen: v5e
topology: v5e:2x2
jax: 0.10.0
libtpu: 0.0.40
codegen_flags: <defaults>
</compile_context>

<pallas_src>
import functools

import numpy as np
import jax
import jax.numpy as jnp
from jax.experimental import pallas as pl
from jax.experimental.pallas import tpu as pltpu


def _round_up(n, m):
    return ((n + m - 1) // m) * m


def encoder_kernel(x_ref, w1_ref, b1_ref, w2_ref, b2_ref, o_ref):
    # x_ref: (TB, F_in)  w1_ref: (F_in, F_hid)  b1_ref: (1, F_hid)
    # w2_ref: (F_hid, F_out) (BN pre-folded)    b2_ref: (1, F_out) (BN pre-folded)
    h = jnp.dot(x_ref[...], w1_ref[...], preferred_element_type=jnp.float32) + b1_ref[...]
    h = jnp.tanh(h)
    # dp_1: eval-mode dropout -> identity.
    # batch_norm_1 (eval, num_features=1): scalar affine folded into w2/b2 in wrapper.
    y = jnp.dot(h.astype(w2_ref.dtype), w2_ref[...],
                preferred_element_type=jnp.float32) + b2_ref[...]
    o_ref[...] = y.astype(o_ref.dtype)


def _fold_bn(params):
    """Fold eval-mode BatchNorm1d(num_features=1) into the second linear."""
    eps = 1e-5
    scale = params["bn_gamma"] / jnp.sqrt(params["bn_running_var"] + eps)
    shift = params["bn_beta"] - params["bn_running_mean"] * scale
    w1_t = params["w1"].T.astype(jnp.float32)                        # (35, 32)
    b1 = params["b1"].reshape(1, 32).astype(jnp.float32)             # (1, 32)
    w2_t = (params["w2"].T * scale).astype(jnp.float32)              # (32, 30)
    b2 = (params["b2"] + shift * params["w2"].T.sum(axis=0)).reshape(1, 30).astype(jnp.float32)
    return w1_t, b1, w2_t, b2


@functools.partial(jax.jit, static_argnames=("tile_rows", "pack3", "use_bf16"))
def _forward_2d(x2d, params, *, tile_rows, pack3, use_bf16):
    B = x2d.shape[0]
    w1_t, b1, w2_t, b2 = _fold_bn(params)

    if pack3:
        # Pack 3 logical rows per kernel row (contiguous reshape is free).
        rows = B // 3
        x_in = x2d.reshape(rows, 3 * 35)                              # (B/3, 105)
        w1_k = jax.scipy.linalg.block_diag(w1_t, w1_t, w1_t)          # (105, 96)
        b1_k = jnp.tile(b1, (1, 3))                                   # (1, 96)
        w2_k = jax.scipy.linalg.block_diag(w2_t, w2_t, w2_t)          # (96, 90)
        b2_k = jnp.tile(b2, (1, 3))                                   # (1, 90)
    else:
        rows = B
        x_in = x2d
        w1_k, b1_k, w2_k, b2_k = w1_t, b1, w2_t, b2

    in_dtype = jnp.bfloat16 if use_bf16 else jnp.float32
    x_in = x_in.astype(in_dtype)
    w1_k = w1_k.astype(in_dtype)
    w2_k = w2_k.astype(in_dtype)

    in_cols = x_in.shape[1]
    hid_cols = w1_k.shape[1]
    out_cols = w2_k.shape[1]

    # Tile sizing: multiple of 8 rows; aim for >= 2 grid steps (megacore sharding on
    # v7x); capped by tile_rows so the lane-padded, double-buffered footprint fits
    # every generation's VMEM (incl. v7x 64 MiB).
    TB = max(8, min(tile_rows, _round_up(pl.cdiv(rows, 2), 8)))
    grid = (pl.cdiv(rows, TB),)

    # x + out double-buffered + hidden intermediate, each lane-padded to 128 f32.
    est_vmem = 6 * TB * 128 * 4 + (8 << 20)
    vmem_limit = int(min(56 << 20, max(24 << 20, est_vmem)))

    out = pl.pallas_call(
        encoder_kernel,
        out_shape=jax.ShapeDtypeStruct((rows, out_cols), jnp.float32),
        grid=grid,
        in_specs=[
            pl.BlockSpec((TB, in_cols), lambda i: (i, 0)),        # x: streamed over batch
            pl.BlockSpec((in_cols, hid_cols), lambda i: (0, 0)),  # W1 (block-diag if packed): resident
            pl.BlockSpec((1, hid_cols), lambda i: (0, 0)),        # b1: resident
            pl.BlockSpec((hid_cols, out_cols), lambda i: (0, 0)), # W2 (BN-folded): resident
            pl.BlockSpec((1, out_cols), lambda i: (0, 0)),        # b2 (BN-folded): resident
        ],
        out_specs=pl.BlockSpec((TB, out_cols), lambda i: (i, 0)),
        compiler_params=pltpu.CompilerParams(
            dimension_semantics=("parallel",),
            vmem_limit_bytes=vmem_limit,
        ),
    )(x_in, w1_k, b1_k, w2_k, b2_k)

    if pack3:
        out = out.reshape(B, 30)
    return out


def esg_encoder_35(x, params, *, tile_rows=8192, use_bf16=False):
    """x: (B, 1, 35) float32. Returns {'x_input': x, 'x_output': (B, 1, 30)}."""
    B = x.shape[0]
    pack3 = (B % 3 == 0) and (B >= 3)
    y2d = _forward_2d(x.reshape(B, 35).astype(jnp.float32), params,
                      tile_rows=tile_rows, pack3=pack3, use_bf16=use_bf16)
    return {"x_input": x, "x_output": y2d.reshape(B, 1, 30)}


def init_params(key):
    """PyTorch-default-style init with non-trivial BN running stats."""
    k1, k2, k3, k4 = jax.random.split(key, 4)
    bound1 = 1.0 / np.sqrt(35.0)
    bound2 = 1.0 / np.sqrt(32.0)
    return {
        "w1": jax.random.uniform(k1, (32, 35), jnp.float32, -bound1, bound1),
        "b1": jax.random.uniform(k2, (32,), jnp.float32, -bound1, bound1),
        "w2": jax.random.uniform(k3, (30, 32), jnp.float32, -bound2, bound2),
        "b2": jax.random.uniform(k4, (30,), jnp.float32, -bound2, bound2),
        "bn_gamma": jnp.asarray(1.3, jnp.float32),
        "bn_beta": jnp.asarray(0.1, jnp.float32),
        "bn_running_mean": jnp.asarray(0.05, jnp.float32),
        "bn_running_var": jnp.asarray(0.9, jnp.float32),
    }


def reference_forward_np(x, params):
    """Host numpy reference of the same (inference) semantics, BN NOT pre-folded."""
    B = x.shape[0]
    h = np.tanh(x.reshape(B, 35) @ params["w1"].T + params["b1"])
    eps = 1e-5
    scale = params["bn_gamma"] / np.sqrt(params["bn_running_var"] + eps)
    shift = params["bn_beta"] - params["bn_running_mean"] * scale
    h = h * scale + shift
    y = h @ params["w2"].T + params["b2"]
    return y.reshape(B, 1, 30).astype(np.float32)


if __name__ == "__main__":
    key = jax.random.PRNGKey(0)
    kp, kx = jax.random.split(key)
    params = init_params(kp)
    params_np = {k: np.asarray(v) for k, v in params.items()}

    # B=6 exercises the pack-3 path; B=7 exercises the unpacked path with a
    # masked partial batch block.
    for B in (6, 7):
        x = jax.random.normal(jax.random.fold_in(kx, B), (B, 1, 35), jnp.float32)
        out = esg_encoder_35(x, params)
        y = jax.block_until_ready(out["x_output"])
        assert y.shape == (B, 1, 30)
        y_ref = reference_forward_np(np.asarray(x), params_np)
        np.testing.assert_allclose(np.asarray(y), y_ref, rtol=1e-2, atol=1e-2)

    print("KERNEL_OK")
</pallas_src>

<mosaic_0001>
module attributes {stable_mosaic.version = 11 : i64} {
  func.func @encoder_kernel(%arg0: i32, %arg1: memref<8x105xf32, #tpu.memory_space<vmem>>, %arg2: memref<105x96xf32, #tpu.memory_space<vmem>>, %arg3: memref<1x96xf32, #tpu.memory_space<vmem>>, %arg4: memref<96x90xf32, #tpu.memory_space<vmem>>, %arg5: memref<1x90xf32, #tpu.memory_space<vmem>>, %arg6: memref<8x90xf32, #tpu.memory_space<vmem>>) attributes {dimension_semantics = [#tpu.dimension_semantics<parallel>], iteration_bounds = array<i64: 1>, scalar_prefetch = 0 : i64, scratch_operands = 0 : i64, tpu.core_type = #tpu.core_type<tc>, window_params = [{transform_indices = @transform_0, window_bounds = array<i64: 8, 105>}, {pipeline_mode = #tpu.pipeline_mode<synchronous>, transform_indices = @transform_1, window_bounds = array<i64: 105, 96>}, {pipeline_mode = #tpu.pipeline_mode<synchronous>, transform_indices = @transform_2, window_bounds = array<i64: 1, 96>}, {pipeline_mode = #tpu.pipeline_mode<synchronous>, transform_indices = @transform_3, window_bounds = array<i64: 96, 90>}, {pipeline_mode = #tpu.pipeline_mode<synchronous>, transform_indices = @transform_4, window_bounds = array<i64: 1, 90>}, {transform_indices = @transform_5, window_bounds = array<i64: 8, 90>}]} {
    %c0 = arith.constant 0 : index
    %c0_0 = arith.constant 0 : index
    %0 = vector.load %arg1[%c0, %c0_0] : memref<8x105xf32, #tpu.memory_space<vmem>>, vector<8x105xf32>
    %c0_1 = arith.constant 0 : index
    %c0_2 = arith.constant 0 : index
    %1 = vector.load %arg2[%c0_1, %c0_2] : memref<105x96xf32, #tpu.memory_space<vmem>>, vector<105x96xf32>
    %cst = arith.constant dense<0.000000e+00> : vector<8x96xf32>
    %2 = tpu.matmul %0, %1, %cst {dimension_numbers = #tpu.dot_dimension_numbers<[1], [0], [0], [1], [0, 0, 1, 1], [], []>} : vector<8x105xf32>, vector<105x96xf32>, vector<8x96xf32> -> vector<8x96xf32>
    %c0_3 = arith.constant 0 : index
    %c0_4 = arith.constant 0 : index
    %3 = vector.load %arg3[%c0_3, %c0_4] : memref<1x96xf32, #tpu.memory_space<vmem>>, vector<1x96xf32>
    %4 = vector.broadcast %3 : vector<1x96xf32> to vector<8x96xf32>
    %5 = arith.addf %2, %4 : vector<8x96xf32>
    %6 = math.tanh %5 : vector<8x96xf32>
    %c0_5 = arith.constant 0 : index
    %c0_6 = arith.constant 0 : index
    %7 = vector.load %arg4[%c0_5, %c0_6] : memref<96x90xf32, #tpu.memory_space<vmem>>, vector<96x90xf32>
    %cst_7 = arith.constant dense<0.000000e+00> : vector<8x90xf32>
    %8 = tpu.matmul %6, %7, %cst_7 {dimension_numbers = #tpu.dot_dimension_numbers<[1], [0], [0], [1], [0, 0, 1, 1], [], []>} : vector<8x96xf32>, vector<96x90xf32>, vector<8x90xf32> -> vector<8x90xf32>
    %c0_8 = arith.constant 0 : index
    %c0_9 = arith.constant 0 : index
    %9 = vector.load %arg5[%c0_8, %c0_9] : memref<1x90xf32, #tpu.memory_space<vmem>>, vector<1x90xf32>
    %10 = vector.broadcast %9 : vector<1x90xf32> to vector<8x90xf32>
    %11 = arith.addf %8, %10 : vector<8x90xf32>
    %c0_10 = arith.constant 0 : index
    %c0_11 = arith.constant 0 : index
    %12 = vector.load %arg6[%c0_10, %c0_11] : memref<8x90xf32, #tpu.memory_space<vmem>>, vector<8x90xf32>
    tpu.vector_store %arg6[%c0_10, %c0_11], %11 {strides = array<i32>} : memref<8x90xf32, #tpu.memory_space<vmem>>, vector<8x90xf32>,
    return
  }
  func.func @transform_0(%arg0: i32) -> (i32, i32) {
    %c0_i32 = arith.constant 0 : i32
    %c0_i32_0 = arith.constant 0 : i32
    return %arg0, %c0_i32 : i32, i32
  }
  func.func @transform_1(%arg0: i32) -> (i32, i32) {
    %c0_i32 = arith.constant 0 : i32
    %c0_i32_0 = arith.constant 0 : i32
    %c0_i32_1 = arith.constant 0 : i32
    return %c0_i32, %c0_i32_0 : i32, i32
  }
  func.func @transform_2(%arg0: i32) -> (i32, i32) {
    %c0_i32 = arith.constant 0 : i32
    %c0_i32_0 = arith.constant 0 : i32
    %c0_i32_1 = arith.constant 0 : i32
    return %c0_i32, %c0_i32_0 : i32, i32
  }
  func.func @transform_3(%arg0: i32) -> (i32, i32) {
    %c0_i32 = arith.constant 0 : i32
    %c0_i32_0 = arith.constant 0 : i32
    %c0_i32_1 = arith.constant 0 : i32
    return %c0_i32, %c0_i32_0 : i32, i32
  }
  func.func @transform_4(%arg0: i32) -> (i32, i32) {
    %c0_i32 = arith.constant 0 : i32
    %c0_i32_0 = arith.constant 0 : i32
    %c0_i32_1 = arith.constant 0 : i32
    return %c0_i32, %c0_i32_0 : i32, i32
  }
  func.func @transform_5(%arg0: i32) -> (i32, i32) {
    %c0_i32 = arith.constant 0 : i32
    %c0_i32_0 = arith.constant 0 : i32
    return %arg0, %c0_i32 : i32, i32
  }
}

</mosaic_0001>

<bundles_post_ra>
// kernel: _forward_2d.1
= control target key start
LH: loop header
LB: loop body
LE: loop exit
PB: predicated region body
PF: predicated region fallthrough
CT: control target
= control target key end

     0   :  { %vm43_vm0 = vcmask 1040384   ;;  %vm39_vm1 = vcmask 859136   ;;  %vm84_vm2 = vcmask 785408   ;;  %vm108_vm3 = vcmask 736256   ;;  %s278_s0 = inlined_call_operand.vmem [shape: f32[2,105], index: 0, kind: input, shape index: {}]   ;;  %s279_s1 = inlined_call_operand.vmem [shape: f32[105,96], index: 1, kind: input, shape index: {}]   ;;  %s280_s2 = inlined_call_operand.vmem [shape: f32[1,96], index: 2, kind: input, shape index: {}]   ;;  %s281_s3 = inlined_call_operand.vmem [shape: f32[96,90], index: 3, kind: input, shape index: {}]   ;;  %s282_s4 = inlined_call_operand.vmem [shape: f32[1,90], index: 4, kind: input, shape index: {}]   ;;  %s283_s5 = inlined_call_operand.vmem [shape: f32[2,90], index: 5, kind: output, shape index: {}]  }
   0x1   :  { %v34_v0 = vld [vmem:[%s279_s1 + $0x68] sm:$0x1]  ;;  %v33_v1 = vld [vmem:[%s279_s1 + $0x60] sm:$0xff]  ;;  %v32_v2 = vld [vmem:[%s279_s1 + $0x58] sm:$0xff] }
   0x2   :  { %151 = vmatpush.msk.msra.mxu0 %vm43_vm0, %v34_v0  ;;  %v31_v3 = vld [vmem:[%s279_s1 + $0x50] sm:$0xff]  ;;  %v79_v4 = vld [vmem:[%s281_s3 + $0x58] sm:$0xff]  ;;  %v30_v6 = vld [vmem:[%s279_s1 + $0x48] sm:$0xff] }
   0x3   :  { %v78_v5 = vld [vmem:[%s281_s3 + $0x50] sm:$0xff]  ;;  %92 = vmatpush.msra.mxu1 %v79_v4  ;;  %v77_v7 = vld [vmem:[%s281_s3 + $0x48] sm:$0xff]  ;;  %v29_v8 = vld [vmem:[%s279_s1 + $0x40] sm:$0xff] }
   0x4   :  { %50 = vmatpush.msra.mxu0 %v33_v1  ;;  %v76_v9 = vld [vmem:[%s281_s3 + $0x40] sm:$0xff]  ;;  %v28_v10 = vld [vmem:[%s279_s1 + $0x38] sm:$0xff]  ;;  %v27_v12 = vld [vmem:[%s279_s1 + $0x30] sm:$0xff] }
   0x5   :  { %93 = vmatpush.msra.mxu1 %v78_v5  ;;  %v75_v11 = vld [vmem:[%s281_s3 + $0x38] sm:$0xff]  ;;  %v74_v13 = vld [vmem:[%s281_s3 + $0x30] sm:$0xff]  ;;  %v26_v14 = vld [vmem:[%s279_s1 + $0x28] sm:$0xff] }
   0x6   :  { %51 = vmatpush.msra.mxu0 %v32_v2  ;;  %v73_v15 = vld [vmem:[%s281_s3 + $0x28] sm:$0xff]  ;;  %v25_v16 = vld [vmem:[%s279_s1 + $0x20] sm:$0xff]  ;;  %v24_v17 = vld [vmem:[%s279_s1 + $0x18] sm:$0xff] }
   0x7   :  { %94 = vmatpush.msra.mxu1 %v77_v7  ;;  %v23_v18 = vld [vmem:[%s279_s1 + $0x10] sm:$0xff]  ;;  %v22_v19 = vld [vmem:[%s279_s1 + $0x8] sm:$0xff]  ;;  %v21_v20 = vld [vmem:[%s279_s1] sm:$0xff] }
   0x8   :  { %52 = vmatpush.msra.mxu0 %v31_v3  ;;  %v20_v21 = vld [vmem:[%s278_s0] sm:$0xff]  ;;  %v71_v23 = vld [vmem:[%s281_s3 + $0x18] sm:$0xff]  ;;  %v70_v24 = vld [vmem:[%s281_s3 + $0x10] sm:$0xff] }
   0x9   :  { %95 = vmatpush.msra.mxu1 %v76_v9  ;;  %v72_v22 = vld [vmem:[%s281_s3 + $0x20] sm:$0xff]  ;;  %v69_v25 = vld [vmem:[%s281_s3 + $0x8] sm:$0xff] }
   0xa   :  { %53 = vmatpush.msra.mxu0 %v30_v6  ;;  %v68_v26 = vld [vmem:[%s281_s3] sm:$0xff] }
   0xb   :  { %96 = vmatpush.msra.mxu1 %v75_v11  ;;  %v154_v27 = vld [vmem:[%s280_s2] ss:$0 sm:$0xff] }
   0xc   :  { %54 = vmatpush.msra.mxu0 %v29_v8  ;;  %v155_v31 = vld [vmem:[%s282_s4] ss:$0 sm:$0xff] }
   0xd   :  { %97 = vmatpush.msra.mxu1 %v74_v13 }
   0xe   :  { %55 = vmatpush.msra.mxu0 %v28_v10 }
   0xf   :  { %98 = vmatpush.msra.mxu1 %v73_v15 }
  0x10   :  { %56 = vmatpush.msra.mxu0 %v27_v12 }
  0x11   :  { %99 = vmatpush.msra.mxu1 %v72_v22 }
  0x12   :  { %57 = vmatpush.msra.mxu0 %v26_v14 }
  0x13   :  { %100 = vmatpush.msra.mxu1 %v71_v23 }
  0x14   :  { %58 = vmatpush.msra.mxu0 %v25_v16 }
  0x15   :  { %101 = vmatpush.msra.mxu1 %v70_v24 }
  0x16   :  { %59 = vmatpush.msra.mxu0 %v24_v17 }
  0x17   :  { %102 = vmatpush.msra.mxu1 %v69_v25 }
  0x18   :  { %60 = vmatpush.msra.mxu0 %v23_v18 }
  0x19   :  { %103 = vmatpush.msra.mxu1 %v68_v26 }
  0x1a   :  { %61 = vmatpush.msra.mxu0 %v22_v19 }
  0x1c   :  { %62 = vmatpush.msra.mxu0 %v21_v20 }
  0x1d   :  { %152 = vmatmul.msk.f32.vlgmr.msra.gmra.mxu0 %vm39_vm1, %v20_v21 }
  0x9a   :  { %v64_v28 = vpop.f32.mrf.mxu0 }
  0x9b   :  { %v65_v29 = vadd.f32 %v154_v27, %v64_v28 }
  0x9d   :  { %156 = vtanh.f32 %v65_v29 }
  0xa3   :  { %v157_v30 = vpop.eup %156 }
  0xa4   :  { %153 = vmatmul.msk.f32.vlgmr.msra.gmra.mxu1 %vm84_vm2, %v157_v30 }
 0x121   :  { %v105_v32 = vpop.f32.mrf.mxu1 }
 0x122   :  { %v106_v33 = vadd.f32 %v155_v31, %v105_v32 }
 0x124   :  { %109 = vst.msk [vmem:[#allocation2] sm:$0xff] %vm108_vm3, %v106_v33 }
 0x12b   :  { %v128_v34 = vld [vmem:[#allocation2] sm:$0x3] }
 0x12c   :  { %129 = vst [vmem:[%s283_s5] sm:$0x3] %v128_v34 }

</bundles_post_ra>
